<compile_context>
chip_gen: v6e
topology: v6e:2x2x1
jax: 0.10.0
libtpu: 0.0.40
codegen_flags: <defaults>
</compile_context>

<pallas_src>
import functools

import jax
import jax.numpy as jnp
import numpy as np
from jax.experimental import pallas as pl
from jax.experimental.pallas import tpu as pltpu


# ---------------------------------------------------------------------------
# Kernel
# ---------------------------------------------------------------------------
def _two_tower_kernel(
    q_ref, p_ref,
    w1q_ref, b1q_ref, w2q_ref, b2q_ref,
    w1p_ref, b1p_ref, w2p_ref, b2p_ref,
    wsq_ref, wsp_ref, bs_ref,
    out_ref,
    xq_pad, xp_pad,
    *, use_cosine: bool,
):
    cdt = w1q_ref.dtype                      # compute dtype (bf16)
    tb, e = q_ref.shape                      # streamed block: (TB, E) f32
    e_pad = xq_pad.shape[1]                  # lane-padded contraction dim

    def stage(x_ref, x_pad):
        # Cast + zero-pad the contraction dim entirely in VMEM (no HBM bytes
        # for the pad columns).  Tail is rewritten every step so this stays
        # correct under megacore grid sharding.
        if e_pad > e:
            x_pad[:, e:] = jnp.zeros((tb, e_pad - e), cdt)
        x_pad[:, :e] = x_ref[...].astype(cdt)
        return x_pad[...]                    # (TB, E_pad) bf16

    def tower(x, w1_ref, b1_ref, w2_ref, b2_ref):
        # Linear -> ReLU -> Linear -> ReLU; bf16 MXU matmuls, f32 accumulation.
        h = jnp.dot(x, w1_ref[...], preferred_element_type=jnp.float32) + b1_ref[...]
        h = jnp.maximum(h, 0.0).astype(cdt)
        v = jnp.dot(h, w2_ref[...], preferred_element_type=jnp.float32) + b2_ref[...]
        return jnp.maximum(v, 0.0)           # (TB, H) f32

    qv = tower(stage(q_ref, xq_pad), w1q_ref, b1q_ref, w2q_ref, b2q_ref)
    pv = tower(stage(p_ref, xp_pad), w1p_ref, b1p_ref, w2p_ref, b2p_ref)

    if use_cosine:
        # F.cosine_similarity(qv, pv, dim=1).unsqueeze(1), eps = 1e-8
        eps = 1e-8
        num = jnp.sum(qv * pv, axis=1, keepdims=True)                       # (TB,1)
        qn = jnp.maximum(jnp.sqrt(jnp.sum(qv * qv, axis=1, keepdims=True)), eps)
        pn = jnp.maximum(jnp.sqrt(jnp.sum(pv * pv, axis=1, keepdims=True)), eps)
        out_ref[...] = num / (qn * pn)       # exact divide (tiny tensor)
    else:
        # sigmoid(cat([qv, pv]) @ Ws.T + bs) without the concat or transposes:
        # Ws pre-split into (1, H) halves; VPU mul + lane reduce -> (TB, 1).
        logits = (jnp.sum(qv * wsq_ref[...], axis=1, keepdims=True)
                  + jnp.sum(pv * wsp_ref[...], axis=1, keepdims=True)
                  + bs_ref[...])
        out_ref[...] = jax.nn.sigmoid(logits)


# ---------------------------------------------------------------------------
# Host-side helpers
# ---------------------------------------------------------------------------
def _round_up(x, m):
    return pl.cdiv(x, m) * m


def prepare_params(params, *, embedding_dim, compute_dtype=jnp.bfloat16, pad_to=128):
    """One-time prep (call at model load, not per forward call):
    transpose Linear weights to [in, out], zero-pad the contraction dim of the
    first layer to a lane multiple, split the scoring weight into (1, H)
    query/passage halves, cast matmul weights to bf16 (biases/epilogue f32)."""
    e_pad = int(_round_up(embedding_dim, pad_to))
    hidden = int(np.asarray(params["w2q"]).shape[0])

    def first_layer(w):                       # torch [H, E] -> [E_pad, H]
        w_t = jnp.asarray(w, jnp.float32).T
        w_t = jnp.pad(w_t, ((0, e_pad - embedding_dim), (0, 0)))
        return w_t.astype(compute_dtype)

    def hidden_layer(w):                      # torch [H, H] -> [H, H]
        return jnp.asarray(w, jnp.float32).T.astype(compute_dtype)

    def bias_row(b):
        return jnp.asarray(b, jnp.float32).reshape(1, -1)

    prep = dict(
        w1q=first_layer(params["w1q"]), b1q=bias_row(params["b1q"]),
        w2q=hidden_layer(params["w2q"]), b2q=bias_row(params["b2q"]),
        w1p=first_layer(params["w1p"]), b1p=bias_row(params["b1p"]),
        w2p=hidden_layer(params["w2p"]), b2p=bias_row(params["b2p"]),
    )
    if "ws" in params:
        ws = jnp.asarray(params["ws"], jnp.float32)          # [1, 2H]
        prep["wsq"] = ws[:, :hidden]                         # (1, H) f32
        prep["wsp"] = ws[:, hidden:]                         # (1, H) f32
        prep["bs"] = jnp.asarray(params["bs"], jnp.float32).reshape(1, 1)
    else:  # cosine-only model: dummy (unused) scoring params
        prep["wsq"] = jnp.zeros((1, hidden), jnp.float32)
        prep["wsp"] = jnp.zeros((1, hidden), jnp.float32)
        prep["bs"] = jnp.zeros((1, 1), jnp.float32)
    return prep


def two_tower_forward(query_emb, passage_emb, prep, *, use_cosine=False, block_b=512):
    """prep: output of prepare_params. Returns [B, 1] f32 scores.

    block_b: batch tile. 512 is the sweet spot for a mem-bound kernel (~85% of
    HBM roofline vs ~29% at 128) and keeps the per-step VMEM footprint well
    under v5e's 16 MiB scoped default (double-buffered f32 inputs + bf16
    staging + f32 intermediates ≈ 5 MiB). If you raise block_b past ~1024 on
    v5e, also set pltpu.CompilerParams(vmem_limit_bytes=...). For small
    batches the tile shrinks so the grid has >=2 steps where possible, letting
    dimension_semantics=('parallel',) shard across v7x's two TensorCores.
    """
    query_emb = jnp.asarray(query_emb)
    passage_emb = jnp.asarray(passage_emb)
    B, E = query_emb.shape
    E_pad, H = prep["w1q"].shape
    compute_dtype = prep["w1q"].dtype

    # Batch tile: multiple of 8 (sublane), >=2 grid steps when batch allows.
    B8 = int(_round_up(B, 8))
    TB = int(min(block_b, max(8, _round_up(pl.cdiv(B8, 2), 8))))
    B_pad = int(_round_up(B, TB))
    grid = (B_pad // TB,)

    def maybe_pad_rows(x):
        # Only pad batch rows when B is not a tile multiple (no dtype cast,
        # no contraction-dim padding -> no extra HBM pass in the common case).
        if B_pad > B:
            x = jnp.pad(x, ((0, B_pad - B), (0, 0)))
        return x

    q = maybe_pad_rows(query_emb)
    p = maybe_pad_rows(passage_emb)

    inputs = (q, p,
              prep["w1q"], prep["b1q"], prep["w2q"], prep["b2q"],
              prep["w1p"], prep["b1p"], prep["w2p"], prep["b2p"],
              prep["wsq"], prep["wsp"], prep["bs"])

    def resident(x):                # whole 2-D array, same block every step
        return pl.BlockSpec(x.shape, lambda i: (0, 0))

    in_specs = ([pl.BlockSpec((TB, E), lambda i: (i, 0)),     # full (unpadded) E
                 pl.BlockSpec((TB, E), lambda i: (i, 0))]
                + [resident(x) for x in inputs[2:]])

    # Advisory cost estimate: this call is HBM-bound on streaming q/p.
    io_bytes = (2 * B_pad * E * q.dtype.itemsize
                + sum(int(v.size) * v.dtype.itemsize for v in inputs[2:])
                + B_pad * 4)
    flops = int(B_pad * (2 * 2 * (E_pad * H + H * H) + 6 * H))
    cost = pl.CostEstimate(flops=flops, transcendentals=int(B_pad),
                           bytes_accessed=int(io_bytes))

    out = pl.pallas_call(
        functools.partial(_two_tower_kernel, use_cosine=use_cosine),
        out_shape=jax.ShapeDtypeStruct((B_pad, 1), jnp.float32),
        grid=grid,
        in_specs=in_specs,
        out_specs=pl.BlockSpec((TB, 1), lambda i: (i, 0)),
        scratch_shapes=[pltpu.VMEM((TB, E_pad), compute_dtype),
                        pltpu.VMEM((TB, E_pad), compute_dtype)],
        compiler_params=pltpu.CompilerParams(
            dimension_semantics=("parallel",)),   # batch tiles independent
        cost_estimate=cost,
    )(*inputs)

    return out[:B, :]


# ---------------------------------------------------------------------------
# Pure-JAX reference (f32, PyTorch-convention weights)
# ---------------------------------------------------------------------------
def _reference_forward(query_emb, passage_emb, params, *, use_cosine=False):
    def tower(x, w1, b1, w2, b2):
        h = jnp.maximum(x @ w1.T + b1, 0.0)
        return jnp.maximum(h @ w2.T + b2, 0.0)

    qv = tower(query_emb, params["w1q"], params["b1q"], params["w2q"], params["b2q"])
    pv = tower(passage_emb, params["w1p"], params["b1p"], params["w2p"], params["b2p"])
    if use_cosine:
        eps = 1e-8
        num = jnp.sum(qv * pv, axis=1, keepdims=True)
        qn = jnp.maximum(jnp.linalg.norm(qv, axis=1, keepdims=True), eps)
        pn = jnp.maximum(jnp.linalg.norm(pv, axis=1, keepdims=True), eps)
        return num / (qn * pn)
    comb = jnp.concatenate([qv, pv], axis=1)
    return jax.nn.sigmoid(comb @ params["ws"].T + params["bs"])


def init_params(key, embedding_dim=300, hidden_dim=128):
    """Deterministic synthetic init (PyTorch Linear.weight convention: [out, in])."""
    ks = jax.random.split(key, 10)

    def lin(kw, kb, out_f, in_f):
        bound = 1.0 / np.sqrt(in_f)
        w = jax.random.uniform(kw, (out_f, in_f), jnp.float32, -bound, bound)
        b = jax.random.uniform(kb, (out_f,), jnp.float32, -bound, bound)
        return w, b

    w1q, b1q = lin(ks[0], ks[1], hidden_dim, embedding_dim)
    w2q, b2q = lin(ks[2], ks[3], hidden_dim, hidden_dim)
    w1p, b1p = lin(ks[4], ks[5], hidden_dim, embedding_dim)
    w2p, b2p = lin(ks[6], ks[7], hidden_dim, hidden_dim)
    ws, bs = lin(ks[8], ks[9], 1, hidden_dim * 2)
    return dict(w1q=w1q, b1q=b1q, w2q=w2q, b2q=b2q,
                w1p=w1p, b1p=b1p, w2p=w2p, b2p=b2p,
                ws=ws, bs=bs)


if __name__ == "__main__":
    B, E, H = 8, 300, 128
    key = jax.random.PRNGKey(0)
    kq, kp, kparams = jax.random.split(key, 3)

    query_emb = jax.random.normal(kq, (B, E), jnp.float32)
    passage_emb = jax.random.normal(kp, (B, E), jnp.float32)
    params = init_params(kparams, embedding_dim=E, hidden_dim=H)

    # one-time weight prep (transpose / pad / split / bf16 cast)
    prep = prepare_params(params, embedding_dim=E)

    # bf16 matmuls with f32 accumulation vs. f32 reference -> relaxed tolerances.
    TOL = dict(rtol=2e-2, atol=2e-2)

    # default path: use_cosine=False (split scoring weights + sigmoid)
    score = two_tower_forward(query_emb, passage_emb, prep, use_cosine=False)
    score = jax.block_until_ready(score)
    ref = _reference_forward(query_emb, passage_emb, params, use_cosine=False)
    np.testing.assert_allclose(np.asarray(score), np.asarray(ref), **TOL)

    # cosine branch
    score_cos = two_tower_forward(query_emb, passage_emb, prep, use_cosine=True)
    score_cos = jax.block_until_ready(score_cos)
    ref_cos = _reference_forward(query_emb, passage_emb, params, use_cosine=True)
    np.testing.assert_allclose(np.asarray(score_cos), np.asarray(ref_cos), **TOL)

    print("KERNEL_OK")
</pallas_src>

<mosaic_0001>
module attributes {stable_mosaic.version = 11 : i64} {
  func.func @_two_tower_kernel(%arg0: i32, %arg1: memref<8x300xf32, #tpu.memory_space<vmem>>, %arg2: memref<8x300xf32, #tpu.memory_space<vmem>>, %arg3: memref<384x128xbf16, #tpu.memory_space<vmem>>, %arg4: memref<1x128xf32, #tpu.memory_space<vmem>>, %arg5: memref<128x128xbf16, #tpu.memory_space<vmem>>, %arg6: memref<1x128xf32, #tpu.memory_space<vmem>>, %arg7: memref<384x128xbf16, #tpu.memory_space<vmem>>, %arg8: memref<1x128xf32, #tpu.memory_space<vmem>>, %arg9: memref<128x128xbf16, #tpu.memory_space<vmem>>, %arg10: memref<1x128xf32, #tpu.memory_space<vmem>>, %arg11: memref<1x128xf32, #tpu.memory_space<vmem>>, %arg12: memref<1x128xf32, #tpu.memory_space<vmem>>, %arg13: memref<1x1xf32, #tpu.memory_space<vmem>>, %arg14: memref<8x1xf32, #tpu.memory_space<vmem>>, %arg15: memref<8x384xbf16, #tpu.memory_space<vmem>>, %arg16: memref<8x384xbf16, #tpu.memory_space<vmem>>) attributes {dimension_semantics = [#tpu.dimension_semantics<parallel>], iteration_bounds = array<i64: 1>, scalar_prefetch = 0 : i64, scratch_operands = 2 : i64, tpu.core_type = #tpu.core_type<tc>, window_params = [{transform_indices = @transform_0, window_bounds = array<i64: 8, 300>}, {transform_indices = @transform_1, window_bounds = array<i64: 8, 300>}, {pipeline_mode = #tpu.pipeline_mode<synchronous>, transform_indices = @transform_2, window_bounds = array<i64: 384, 128>}, {pipeline_mode = #tpu.pipeline_mode<synchronous>, transform_indices = @transform_3, window_bounds = array<i64: 1, 128>}, {pipeline_mode = #tpu.pipeline_mode<synchronous>, transform_indices = @transform_4, window_bounds = array<i64: 128, 128>}, {pipeline_mode = #tpu.pipeline_mode<synchronous>, transform_indices = @transform_5, window_bounds = array<i64: 1, 128>}, {pipeline_mode = #tpu.pipeline_mode<synchronous>, transform_indices = @transform_6, window_bounds = array<i64: 384, 128>}, {pipeline_mode = #tpu.pipeline_mode<synchronous>, transform_indices = @transform_7, window_bounds = array<i64: 1, 128>}, {pipeline_mode = #tpu.pipeline_mode<synchronous>, transform_indices = @transform_8, window_bounds = array<i64: 128, 128>}, {pipeline_mode = #tpu.pipeline_mode<synchronous>, transform_indices = @transform_9, window_bounds = array<i64: 1, 128>}, {pipeline_mode = #tpu.pipeline_mode<synchronous>, transform_indices = @transform_10, window_bounds = array<i64: 1, 128>}, {pipeline_mode = #tpu.pipeline_mode<synchronous>, transform_indices = @transform_11, window_bounds = array<i64: 1, 128>}, {pipeline_mode = #tpu.pipeline_mode<synchronous>, transform_indices = @transform_12, window_bounds = array<i64: 1, 1>}, {transform_indices = @transform_13, window_bounds = array<i64: 8, 1>}]} {
    %cst = arith.constant 0.000000e+00 : bf16
    %0 = vector.broadcast %cst : bf16 to vector<8x84xbf16>
    %c0 = arith.constant 0 : index
    %c300 = arith.constant 300 : index
    %1 = vector.load %arg15[%c0, %c300] : memref<8x384xbf16, #tpu.memory_space<vmem>>, vector<8x84xbf16>
    tpu.vector_store %arg15[%c0, %c300], %0 {strides = array<i32>} : memref<8x384xbf16, #tpu.memory_space<vmem>>, vector<8x84xbf16>,
    %c0_0 = arith.constant 0 : index
    %c0_1 = arith.constant 0 : index
    %2 = vector.load %arg1[%c0_0, %c0_1] : memref<8x300xf32, #tpu.memory_space<vmem>>, vector<8x300xf32>
    %3 = arith.truncf %2 : vector<8x300xf32> to vector<8x300xbf16>
    %c0_2 = arith.constant 0 : index
    %c0_3 = arith.constant 0 : index
    %4 = vector.load %arg15[%c0_2, %c0_3] : memref<8x384xbf16, #tpu.memory_space<vmem>>, vector<8x300xbf16>
    tpu.vector_store %arg15[%c0_2, %c0_3], %3 {strides = array<i32>} : memref<8x384xbf16, #tpu.memory_space<vmem>>, vector<8x300xbf16>,
    %c0_4 = arith.constant 0 : index
    %c0_5 = arith.constant 0 : index
    %5 = vector.load %arg15[%c0_4, %c0_5] : memref<8x384xbf16, #tpu.memory_space<vmem>>, vector<8x384xbf16>
    %c0_6 = arith.constant 0 : index
    %c0_7 = arith.constant 0 : index
    %6 = vector.load %arg3[%c0_6, %c0_7] : memref<384x128xbf16, #tpu.memory_space<vmem>>, vector<384x128xbf16>
    %cst_8 = arith.constant dense<0.000000e+00> : vector<8x128xf32>
    %7 = tpu.matmul %5, %6, %cst_8 {dimension_numbers = #tpu.dot_dimension_numbers<[1], [0], [0], [1], [0, 0, 1, 1], [], []>} : vector<8x384xbf16>, vector<384x128xbf16>, vector<8x128xf32> -> vector<8x128xf32>
    %c0_9 = arith.constant 0 : index
    %c0_10 = arith.constant 0 : index
    %8 = vector.load %arg4[%c0_9, %c0_10] : memref<1x128xf32, #tpu.memory_space<vmem>>, vector<1x128xf32>
    %9 = vector.broadcast %8 : vector<1x128xf32> to vector<8x128xf32>
    %10 = arith.addf %7, %9 : vector<8x128xf32>
    %cst_11 = arith.constant 0.000000e+00 : f32
    %11 = vector.broadcast %cst_11 : f32 to vector<8x128xf32>
    %12 = arith.maximumf %10, %11 : vector<8x128xf32>
    %13 = arith.truncf %12 : vector<8x128xf32> to vector<8x128xbf16>
    %c0_12 = arith.constant 0 : index
    %c0_13 = arith.constant 0 : index
    %14 = vector.load %arg5[%c0_12, %c0_13] : memref<128x128xbf16, #tpu.memory_space<vmem>>, vector<128x128xbf16>
    %cst_14 = arith.constant dense<0.000000e+00> : vector<8x128xf32>
    %15 = tpu.matmul %13, %14, %cst_14 {dimension_numbers = #tpu.dot_dimension_numbers<[1], [0], [0], [1], [0, 0, 1, 1], [], []>} : vector<8x128xbf16>, vector<128x128xbf16>, vector<8x128xf32> -> vector<8x128xf32>
    %c0_15 = arith.constant 0 : index
    %c0_16 = arith.constant 0 : index
    %16 = vector.load %arg6[%c0_15, %c0_16] : memref<1x128xf32, #tpu.memory_space<vmem>>, vector<1x128xf32>
    %17 = vector.broadcast %16 : vector<1x128xf32> to vector<8x128xf32>
    %18 = arith.addf %15, %17 : vector<8x128xf32>
    %cst_17 = arith.constant 0.000000e+00 : f32
    %19 = vector.broadcast %cst_17 : f32 to vector<8x128xf32>
    %20 = arith.maximumf %18, %19 : vector<8x128xf32>
    %cst_18 = arith.constant 0.000000e+00 : bf16
    %21 = vector.broadcast %cst_18 : bf16 to vector<8x84xbf16>
    %c0_19 = arith.constant 0 : index
    %c300_20 = arith.constant 300 : index
    %22 = vector.load %arg16[%c0_19, %c300_20] : memref<8x384xbf16, #tpu.memory_space<vmem>>, vector<8x84xbf16>
    tpu.vector_store %arg16[%c0_19, %c300_20], %21 {strides = array<i32>} : memref<8x384xbf16, #tpu.memory_space<vmem>>, vector<8x84xbf16>,
    %c0_21 = arith.constant 0 : index
    %c0_22 = arith.constant 0 : index
    %23 = vector.load %arg2[%c0_21, %c0_22] : memref<8x300xf32, #tpu.memory_space<vmem>>, vector<8x300xf32>
    %24 = arith.truncf %23 : vector<8x300xf32> to vector<8x300xbf16>
    %c0_23 = arith.constant 0 : index
    %c0_24 = arith.constant 0 : index
    %25 = vector.load %arg16[%c0_23, %c0_24] : memref<8x384xbf16, #tpu.memory_space<vmem>>, vector<8x300xbf16>
    tpu.vector_store %arg16[%c0_23, %c0_24], %24 {strides = array<i32>} : memref<8x384xbf16, #tpu.memory_space<vmem>>, vector<8x300xbf16>,
    %c0_25 = arith.constant 0 : index
    %c0_26 = arith.constant 0 : index
    %26 = vector.load %arg16[%c0_25, %c0_26] : memref<8x384xbf16, #tpu.memory_space<vmem>>, vector<8x384xbf16>
    %c0_27 = arith.constant 0 : index
    %c0_28 = arith.constant 0 : index
    %27 = vector.load %arg7[%c0_27, %c0_28] : memref<384x128xbf16, #tpu.memory_space<vmem>>, vector<384x128xbf16>
    %cst_29 = arith.constant dense<0.000000e+00> : vector<8x128xf32>
    %28 = tpu.matmul %26, %27, %cst_29 {dimension_numbers = #tpu.dot_dimension_numbers<[1], [0], [0], [1], [0, 0, 1, 1], [], []>} : vector<8x384xbf16>, vector<384x128xbf16>, vector<8x128xf32> -> vector<8x128xf32>
    %c0_30 = arith.constant 0 : index
    %c0_31 = arith.constant 0 : index
    %29 = vector.load %arg8[%c0_30, %c0_31] : memref<1x128xf32, #tpu.memory_space<vmem>>, vector<1x128xf32>
    %30 = vector.broadcast %29 : vector<1x128xf32> to vector<8x128xf32>
    %31 = arith.addf %28, %30 : vector<8x128xf32>
    %cst_32 = arith.constant 0.000000e+00 : f32
    %32 = vector.broadcast %cst_32 : f32 to vector<8x128xf32>
    %33 = arith.maximumf %31, %32 : vector<8x128xf32>
    %34 = arith.truncf %33 : vector<8x128xf32> to vector<8x128xbf16>
    %c0_33 = arith.constant 0 : index
    %c0_34 = arith.constant 0 : index
    %35 = vector.load %arg9[%c0_33, %c0_34] : memref<128x128xbf16, #tpu.memory_space<vmem>>, vector<128x128xbf16>
    %cst_35 = arith.constant dense<0.000000e+00> : vector<8x128xf32>
    %36 = tpu.matmul %34, %35, %cst_35 {dimension_numbers = #tpu.dot_dimension_numbers<[1], [0], [0], [1], [0, 0, 1, 1], [], []>} : vector<8x128xbf16>, vector<128x128xbf16>, vector<8x128xf32> -> vector<8x128xf32>
    %c0_36 = arith.constant 0 : index
    %c0_37 = arith.constant 0 : index
    %37 = vector.load %arg10[%c0_36, %c0_37] : memref<1x128xf32, #tpu.memory_space<vmem>>, vector<1x128xf32>
    %38 = vector.broadcast %37 : vector<1x128xf32> to vector<8x128xf32>
    %39 = arith.addf %36, %38 : vector<8x128xf32>
    %cst_38 = arith.constant 0.000000e+00 : f32
    %40 = vector.broadcast %cst_38 : f32 to vector<8x128xf32>
    %41 = arith.maximumf %39, %40 : vector<8x128xf32>
    %c0_39 = arith.constant 0 : index
    %c0_40 = arith.constant 0 : index
    %42 = vector.load %arg11[%c0_39, %c0_40] : memref<1x128xf32, #tpu.memory_space<vmem>>, vector<1x128xf32>
    %43 = vector.broadcast %42 : vector<1x128xf32> to vector<8x128xf32>
    %44 = arith.mulf %20, %43 : vector<8x128xf32>
    %cst_41 = arith.constant dense<0.000000e+00> : vector<8xf32>
    %45 = vector.multi_reduction <add>, %44, %cst_41 [1] : vector<8x128xf32> to vector<8xf32>
    %46 = vector.shape_cast %45 : vector<8xf32> to vector<8x1xf32>
    %c0_42 = arith.constant 0 : index
    %c0_43 = arith.constant 0 : index
    %47 = vector.load %arg12[%c0_42, %c0_43] : memref<1x128xf32, #tpu.memory_space<vmem>>, vector<1x128xf32>
    %48 = vector.broadcast %47 : vector<1x128xf32> to vector<8x128xf32>
    %49 = arith.mulf %41, %48 : vector<8x128xf32>
    %cst_44 = arith.constant dense<0.000000e+00> : vector<8xf32>
    %50 = vector.multi_reduction <add>, %49, %cst_44 [1] : vector<8x128xf32> to vector<8xf32>
    %51 = vector.shape_cast %50 : vector<8xf32> to vector<8x1xf32>
    %52 = arith.addf %46, %51 : vector<8x1xf32>
    %c0_45 = arith.constant 0 : index
    %c0_46 = arith.constant 0 : index
    %53 = vector.load %arg13[%c0_45, %c0_46] : memref<1x1xf32, #tpu.memory_space<vmem>>, vector<1x1xf32>
    %54 = vector.broadcast %53 : vector<1x1xf32> to vector<8x1xf32>
    %55 = arith.addf %52, %54 : vector<8x1xf32>
    %56 = arith.negf %55 : vector<8x1xf32>
    %57 = math.exp %56 : vector<8x1xf32>
    %cst_47 = arith.constant 1.000000e+00 : f32
    %58 = vector.broadcast %cst_47 : f32 to vector<8x1xf32>
    %59 = arith.addf %58, %57 : vector<8x1xf32>
    %60 = arith.divf %58, %59 : vector<8x1xf32>
    %c0_48 = arith.constant 0 : index
    %c0_49 = arith.constant 0 : index
    %61 = vector.load %arg14[%c0_48, %c0_49] : memref<8x1xf32, #tpu.memory_space<vmem>>, vector<8x1xf32>
    tpu.vector_store %arg14[%c0_48, %c0_49], %60 {strides = array<i32>} : memref<8x1xf32, #tpu.memory_space<vmem>>, vector<8x1xf32>,
    return
  }
  func.func @transform_0(%arg0: i32) -> (i32, i32) {
    %c0_i32 = arith.constant 0 : i32
    %c0_i32_0 = arith.constant 0 : i32
    return %arg0, %c0_i32 : i32, i32
  }
  func.func @transform_1(%arg0: i32) -> (i32, i32) {
    %c0_i32 = arith.constant 0 : i32
    %c0_i32_0 = arith.constant 0 : i32
    return %arg0, %c0_i32 : i32, i32
  }
  func.func @transform_2(%arg0: i32) -> (i32, i32) {
    %c0_i32 = arith.constant 0 : i32
    %c0_i32_0 = arith.constant 0 : i32
    %c0_i32_1 = arith.constant 0 : i32
    return %c0_i32, %c0_i32_0 : i32, i32
  }
  func.func @transform_3(%arg0: i32) -> (i32, i32) {
    %c0_i32 = arith.constant 0 : i32
    %c0_i32_0 = arith.constant 0 : i32
    %c0_i32_1 = arith.constant 0 : i32
    return %c0_i32, %c0_i32_0 : i32, i32
  }
  func.func @transform_4(%arg0: i32) -> (i32, i32) {
    %c0_i32 = arith.constant 0 : i32
    %c0_i32_0 = arith.constant 0 : i32
    %c0_i32_1 = arith.constant 0 : i32
    return %c0_i32, %c0_i32_0 : i32, i32
  }
  func.func @transform_5(%arg0: i32) -> (i32, i32) {
    %c0_i32 = arith.constant 0 : i32
    %c0_i32_0 = arith.constant 0 : i32
    %c0_i32_1 = arith.constant 0 : i32
    return %c0_i32, %c0_i32_0 : i32, i32
  }
  func.func @transform_6(%arg0: i32) -> (i32, i32) {
    %c0_i32 = arith.constant 0 : i32
    %c0_i32_0 = arith.constant 0 : i32
    %c0_i32_1 = arith.constant 0 : i32
    return %c0_i32, %c0_i32_0 : i32, i32
  }
  func.func @transform_7(%arg0: i32) -> (i32, i32) {
    %c0_i32 = arith.constant 0 : i32
    %c0_i32_0 = arith.constant 0 : i32
    %c0_i32_1 = arith.constant 0 : i32
    return %c0_i32, %c0_i32_0 : i32, i32
  }
  func.func @transform_8(%arg0: i32) -> (i32, i32) {
    %c0_i32 = arith.constant 0 : i32
    %c0_i32_0 = arith.constant 0 : i32
    %c0_i32_1 = arith.constant 0 : i32
    return %c0_i32, %c0_i32_0 : i32, i32
  }
  func.func @transform_9(%arg0: i32) -> (i32, i32) {
    %c0_i32 = arith.constant 0 : i32
    %c0_i32_0 = arith.constant 0 : i32
    %c0_i32_1 = arith.constant 0 : i32
    return %c0_i32, %c0_i32_0 : i32, i32
  }
  func.func @transform_10(%arg0: i32) -> (i32, i32) {
    %c0_i32 = arith.constant 0 : i32
    %c0_i32_0 = arith.constant 0 : i32
    %c0_i32_1 = arith.constant 0 : i32
    return %c0_i32, %c0_i32_0 : i32, i32
  }
  func.func @transform_11(%arg0: i32) -> (i32, i32) {
    %c0_i32 = arith.constant 0 : i32
    %c0_i32_0 = arith.constant 0 : i32
    %c0_i32_1 = arith.constant 0 : i32
    return %c0_i32, %c0_i32_0 : i32, i32
  }
  func.func @transform_12(%arg0: i32) -> (i32, i32) {
    %c0_i32 = arith.constant 0 : i32
    %c0_i32_0 = arith.constant 0 : i32
    %c0_i32_1 = arith.constant 0 : i32
    return %c0_i32, %c0_i32_0 : i32, i32
  }
  func.func @transform_13(%arg0: i32) -> (i32, i32) {
    %c0_i32 = arith.constant 0 : i32
    %c0_i32_0 = arith.constant 0 : i32
    return %arg0, %c0_i32 : i32, i32
  }
}

</mosaic_0001>

<bundles_post_ra>
// kernel: tpu_custom_call.1
= control target key start
LH: loop header
LB: loop body
LE: loop exit
PB: predicated region body
PF: predicated region fallthrough
CT: control target
= control target key end

     0   :  { %s1658_s0 = inlined_call_operand.hbm [shape: f32[8,300], index: 0, kind: input, shape index: {}]   ;;  %s1659_s1 = inlined_call_operand.hbm [shape: f32[8,300], index: 1, kind: input, shape index: {}]   ;;  %s1660_s2 = inlined_call_operand.hbm [shape: bf16[384,128], index: 2, kind: input, shape index: {}]   ;;  %s1661_s3 = inlined_call_operand.vmem [shape: f32[1,128], index: 3, kind: input, shape index: {}]   ;;  %s1662_s4 = inlined_call_operand.hbm [shape: bf16[128,128], index: 4, kind: input, shape index: {}]   ;;  %s1663_s5 = inlined_call_operand.vmem [shape: f32[1,128], index: 5, kind: input, shape index: {}]   ;;  %s1664_s6 = inlined_call_operand.hbm [shape: bf16[384,128], index: 6, kind: input, shape index: {}]   ;;  %s1665_s7 = inlined_call_operand.vmem [shape: f32[1,128], index: 7, kind: input, shape index: {}]   ;;  %s1666_s8 = inlined_call_operand.hbm [shape: bf16[128,128], index: 8, kind: input, shape index: {}]   ;;  %s1667_s9 = inlined_call_operand.vmem [shape: f32[1,128], index: 9, kind: input, shape index: {}]   ;;  %s1668_s10 = inlined_call_operand.vmem [shape: f32[1,128], index: 10, kind: input, shape index: {}]   ;;  %s1669_s11 = inlined_call_operand.vmem [shape: f32[1,128], index: 11, kind: input, shape index: {}]   ;;  %s1670_s12 = inlined_call_operand.<no memory space> [shape: f32[1,1], index: 12, kind: input, shape index: {}]   ;;  %s1671_s13 = inlined_call_operand.vmem [shape: f32[8,1], index: 13, kind: output, shape index: {}]  }
   0x1   :  { %v18_v0 = vstv %s1670_s12 }
   0x2   :  { %19 = vst [vmem:[#allocation4] sm:$0x1] %v18_v0 }
   0x3   :  { %20 = vsyncpa [#allocation6], 0 }
   0x4   :  { %21 = vsyncpa [#allocation8], 0 }
   0x5   :  { %22 = vsyncpa [#allocation11], 0 }
   0x6   :  { %23 = vsyncpa [#allocation14], 0  ;;  %s1481_s27 = smov [#allocation7]  }
   0x7   :  { %s40_s28 = sshll.u32 %s1481_s27, 4  ;;  %s41_s28 = int_to_ptr.vmem [resolvable:$true] %s40_s28 }
   0x8   :  { %s1361_s29 = scalar_lea.vmem %s41_s28, 384  ;;  %p1366_p1 = scmp.lt.s32.totalorder %s41_s28, %s41_s28 }
   0x9   :  { %p1362_p0 = scmp.ne.s32.totalorder %s41_s28, %s1361_s29  ;;  %p1367_p2 = scmp.lt.s32.totalorder %s1361_s29, %s1361_s29 }
   0xb   :  { %p1368_p3 = por %p1367_p2, %p1366_p1 }
   0xd   :  { %p1369_p4 = pnand %p1368_p3, %p1362_p0 }
   0xf   :  { %1372 = shalt.err (!%p1369_p4)
}
  0x10   :  { %43 = dma.hbm_to_vmem [thread:$0]  %s1659_s1, 384, %s41_s28, [#allocation8]  }
  0x11   :  { %s1482_s12 = smov [#allocation10]   ;;  %s1483_s16 = smov [#allocation5]  }
  0x12   :  { %s63_s15 = sshll.u32 %s1482_s12, 4  ;;  %s30_s17 = sshll.u32 %s1483_s16, 4  ;;  %s64_s15 = int_to_ptr.vmem [resolvable:$true] %s63_s15  ;;  %s31_s17 = int_to_ptr.vmem [resolvable:$true] %s30_s17 }
  0x13   :  { %s1381_s18 = scalar_lea.vmem %s64_s15, 1024  ;;  %p1386_p6 = scmp.lt.s32.totalorder %s64_s15, %s64_s15 }
  0x14   :  { %p1382_p5 = scmp.ne.s32.totalorder %s64_s15, %s1381_s18  ;;  %p1387_p7 = scmp.lt.s32.totalorder %s1381_s18, %s1381_s18 }
  0x16   :  { %p1388_p8 = por %p1387_p7, %p1386_p6 }
  0x18   :  { %p1389_p9 = pnand %p1388_p8, %p1382_p5 }
  0x1a   :  { %1392 = shalt.err (!%p1389_p9)
}
  0x1b   :  { %s1484_s19 = smov 64   ;;  %s1485_s20 = smov 4  }
  0x1c   :  { %69 = dma.hbm_to_vmem [thread:$0]  %s1662_s4, 1024, %s64_s15, [#allocation11], %s1484_s19, %s1484_s19, %s1485_s20  }
  0x1d   :  { %s1401_s1 = scalar_lea.vmem %s31_s17, 384  ;;  %p1406_p11 = scmp.lt.s32.totalorder %s31_s17, %s31_s17 }
  0x1e   :  { %p1402_p10 = scmp.ne.s32.totalorder %s31_s17, %s1401_s1  ;;  %p1407_p12 = scmp.lt.s32.totalorder %s1401_s1, %s1401_s1 }
  0x20   :  { %p1408_p13 = por %p1407_p12, %p1406_p11 }
  0x22   :  { %p1409_p0 = pnand %p1408_p13, %p1402_p10 }
  0x24   :  { %1412 = shalt.err (!%p1409_p0)
}
  0x25   :  { %33 = dma.hbm_to_vmem [thread:$0]  %s1658_s0, 384, %s31_s17, [#allocation6]  }
  0x26   :  { %s1486_s25 = smov [#allocation9]   ;;  %s1487_s27 = smov [#allocation12]  }
  0x27   :  { %s49_s26 = sshll.u32 %s1486_s25, 4  ;;  %s77_s28 = sshll.u32 %s1487_s27, 4  ;;  %s50_s26 = int_to_ptr.vmem [resolvable:$true] %s49_s26  ;;  %s78_s28 = int_to_ptr.vmem [resolvable:$true] %s77_s28 }
  0x28   :  { %s1421_s29 = scalar_lea.vmem %s50_s26, 3072  ;;  %p1426_p2 = scmp.lt.s32.totalorder %s50_s26, %s50_s26 }
  0x29   :  { %p1422_p1 = scmp.ne.s32.totalorder %s50_s26, %s1421_s29  ;;  %p1427_p3 = scmp.lt.s32.totalorder %s1421_s29, %s1421_s29 }
  0x2b   :  { %p1428_p4 = por %p1427_p3, %p1426_p2 }
  0x2d   :  { %p1429_p5 = pnand %p1428_p4, %p1422_p1 }
  0x2f   :  { %1432 = shalt.err (!%p1429_p5)
}
  0x30   :  { %55 = dma.hbm_to_vmem [thread:$0]  %s1660_s2, 3072, %s50_s26, [#allocation8], %s1484_s19, %s1484_s19, %s1485_s20  }
  0x31   :  { %s1441_s0 = scalar_lea.vmem %s78_s28, 3072  ;;  %p1446_p7 = scmp.lt.s32.totalorder %s78_s28, %s78_s28 }
  0x32   :  { %p1442_p6 = scmp.ne.s32.totalorder %s78_s28, %s1441_s0  ;;  %p1447_p8 = scmp.lt.s32.totalorder %s1441_s0, %s1441_s0 }
  0x34   :  { %p1448_p9 = por %p1447_p8, %p1446_p7 }
  0x36   :  { %p1449_p10 = pnand %p1448_p9, %p1442_p6 }
  0x38   :  { %1452 = shalt.err (!%p1449_p10)
}
  0x39   :  { %83 = dma.hbm_to_vmem [thread:$0]  %s1664_s6, 3072, %s78_s28, [#allocation11], %s1484_s19, %s1484_s19, %s1485_s20  }
  0x3a   :  { %s1488_s15 = smov [#allocation13]  }
  0x3b   :  { %s91_s16 = sshll.u32 %s1488_s15, 4  ;;  %s92_s16 = int_to_ptr.vmem [resolvable:$true] %s91_s16 }
  0x3c   :  { %s1461_s17 = scalar_lea.vmem %s92_s16, 1024  ;;  %p1466_p12 = scmp.lt.s32.totalorder %s92_s16, %s92_s16 }
  0x3d   :  { %p1462_p11 = scmp.ne.s32.totalorder %s92_s16, %s1461_s17  ;;  %p1467_p13 = scmp.lt.s32.totalorder %s1461_s17, %s1461_s17 }
  0x3f   :  { %p1468_p0 = por %p1467_p13, %p1466_p12 }
  0x41   :  { %p1469_p1 = pnand %p1468_p0, %p1462_p11 }
  0x43   :  { %1472 = shalt.err (!%p1469_p1)
}
  0x44   :  { %97 = dma.hbm_to_vmem [thread:$0]  %s1666_s8, 1024, %s92_s16, [#allocation14], %s1484_s19, %s1484_s19, %s1485_s20  }
  0x45   :  { %1473 = dma.done.wait [#allocation6], 384  }
  0x46   :  { %1474 = vsyncadd [#allocation6], 4294966912 }
  0x47   :  { %1475 = dma.done.wait [#allocation8], 3456  }
  0x48   :  { %1476 = vsyncadd [#allocation8], 4294963840 }
  0x49   :  { %1477 = dma.done.wait [#allocation11], 4096  }
  0x4a   :  { %1478 = vsyncadd [#allocation11], 4294963200 }
  0x4b   :  { %1479 = dma.done.wait [#allocation14], 1024  }
  0x4c   :  { %1480 = vsyncadd [#allocation14], 4294966272  ;;  %vm125_vm0 = vcmask 1043808   ;;  %v1489_v1 = vmov 0.0   ;;  %vm1490_vm1 = vmmov 0   ;;  %v1491_v2 = vmov 0  }
  0x4d   :  { %1188 = vmatprep.subr.bf16.mxu1 %v1489_v1  ;;  %1204 = vmatprep.mubr.msk.bf16.mxu1 %vm1490_vm1, %v1489_v1  ;;  %126 = vst.msk [vmem:[#allocation2 + $0x8] sm:$0xf] %vm125_vm0, %v1491_v2  ;;  %552 = vst.msk [vmem:[#allocation3 + $0x8] sm:$0xf] %vm125_vm0, %v1491_v2  ;;  %v1279_v3 = vld [vmem:[#allocation9 + $0x78] sm:$0xff]   ;;  %v1282_v6 = vld [vmem:[#allocation9 + $0x70] sm:$0xff]  }
  0x4e   :  { %v1280_v4 = vld [vmem:[#allocation9 + $0x38] sm:$0xff]   ;;  %1108 = vmatprep.subr.bf16.mxu0 %v1279_v3  ;;  %v1283_v7 = vld [vmem:[#allocation9 + $0x30] sm:$0xff]   ;;  %v1285_v9 = vld [vmem:[#allocation9 + $0x68] sm:$0xff]   ;;  %vm144_vm2 = vcmask 355328   ;;  %vm1012_vm3 = vcmask 7168  }
  0x4f   :  { %v1281_v5 = vld [vmem:[#allocation9 + $0xb8] sm:$0xff]   ;;  %1109 = vmatpush3.bf16.msra.mxu0 %v1280_v4  ;;  %v1284_v8 = vld [vmem:[#allocation9 + $0xb0] sm:$0xff]   ;;  %v1286_v10 = vld [vmem:[#allocation9 + $0x28] sm:$0xff]  }
  0x50   :  { %1189 = vmatpush3.bf16.msra.mxu1 %v1281_v5  ;;  %1110 = vmatprep.subr.bf16.mxu0 %v1282_v6  ;;  %v1287_v11 = vld [vmem:[#allocation9 + $0xa8] sm:$0xff]   ;;  %v1288_v12 = vld [vmem:[#allocation9 + $0x60] sm:$0xff]   ;;  %v1291_v15 = vld [vmem:[#allocation9 + $0x58] sm:$0xff]  }
  0x51   :  { %1190 = vmatprep.subr.bf16.mxu1 %v1489_v1  ;;  %v1289_v13 = vld [vmem:[#allocation9 + $0x20] sm:$0xff]   ;;  %v1292_v16 = vld [vmem:[#allocation9 + $0x18] sm:$0xff]   ;;  %v1294_v18 = vld [vmem:[#allocation9 + $0x50] sm:$0xff]  }
  0x52   :  { %v1290_v14 = vld [vmem:[#allocation9 + $0xa0] sm:$0xff]   ;;  %v1293_v17 = vld [vmem:[#allocation9 + $0x98] sm:$0xff]   ;;  %v1295_v19 = vld [vmem:[#allocation9 + $0x10] sm:$0xff]  }
  0x53   :  { %1111 = vmatpush3.bf16.msra.mxu0 %v1283_v7  ;;  %v1296_v20 = vld [vmem:[#allocation9 + $0x90] sm:$0xff]   ;;  %v1297_v21 = vld [vmem:[#allocation9 + $0x48] sm:$0xff]   ;;  %v1300_v24 = vld [vmem:[#allocation9 + $0x40] sm:$0xff]  }
  0x54   :  { %1191 = vmatpush3.bf16.msra.mxu1 %v1284_v8  ;;  %1112 = vmatprep.subr.bf16.mxu0 %v1285_v9  ;;  %v1298_v22 = vld [vmem:[#allocation9 + $0x8] sm:$0xff]   ;;  %v127_v25 = vld [vmem:[#allocation5] sm:$0xff]  ;;  %v128_v26 = vld [vmem:[#allocation5 + $0x8] sm:$0xff] }
  0x55   :  { %1192 = vmatprep.subr.bf16.mxu1 %v1489_v1  ;;  %v1299_v23 = vld [vmem:[#allocation9 + $0x88] sm:$0xff]   ;;  %v129_v27 = vld [vmem:[#allocation5 + $0x10] sm:$0xff]  ;;  %v1349_v30 = vpack.c.bf16 %v128_v26, %v128_v26  ;;  %v1304_v32 = vld [vmem:[#allocation10 + $0x38] sm:$0xff]   ;;  %v1350_v33 = vpack.c.bf16 %v127_v25, %v127_v25 }
  0x56   :  { %v1105_v28 = vpack.c.bf16 %v129_v27, %v129_v27  ;;  %v1301_v29 = vld [vmem:[#allocation9] sm:$0xff]   ;;  %v1305_v34 = vld [vmem:[#allocation10 + $0x30] sm:$0xff]   ;;  %v1306_v36 = vld [vmem:[#allocation10 + $0x28] sm:$0xff]  }
  0x57   :  { %1113 = vmatpush3.bf16.msra.mxu0 %v1286_v10  ;;  %v1302_v31 = vld [vmem:[#allocation9 + $0x80] sm:$0xff]   ;;  %390 = vmatprep.mubr.bf16.mxu0 %v1349_v30  ;;  %v1308_v38 = vld [vmem:[#allocation10 + $0x18] sm:$0xff]   ;;  %v1310_v40 = vld [vmem:[#allocation10 + $0x10] sm:$0xff]  }
  0x58   :  { %1193 = vmatpush3.bf16.msra.mxu1 %v1287_v11  ;;  %1114 = vmatprep.subr.bf16.mxu0 %v1288_v12  ;;  %145 = vst.msk [vmem:[#allocation2 + $0x8] sm:$0xf] %vm144_vm2, %v1105_v28  ;;  %v1307_v37 = vld [vmem:[#allocation10 + $0x20] sm:$0xff]   ;;  %v1309_v39 = vld [vmem:[#allocation12 + $0x78] sm:$0xff]   ;;  %v1312_v42 = vld [vmem:[#allocation12 + $0x70] sm:$0xff]  }
  0x59   :  { %1194 = vmatprep.subr.bf16.mxu1 %v1489_v1  ;;  %v1311_v41 = vld [vmem:[#allocation12 + $0x38] sm:$0xff]   ;;  %v1313_v43 = vld [vmem:[#allocation10 + $0x8] sm:$0xff]   ;;  %v1314_v44 = vld [vmem:[#allocation12 + $0x30] sm:$0xff]  }
  0x5a   :  { %v1315_v45 = vld [vmem:[#allocation12 + $0x68] sm:$0xff]   ;;  %v1316_v46 = vld [vmem:[#allocation10] sm:$0xff]   ;;  %v1321_v50 = vld [vmem:[#allocation12 + $0x58] sm:$0xff]  }
  0x5b   :  { %1115 = vmatpush3.bf16.msra.mxu0 %v1289_v13  ;;  %v1317_v47 = vld [vmem:[#allocation12 + $0x28] sm:$0xff]   ;;  %v1318_v48 = vld [vmem:[#allocation12 + $0x60] sm:$0xff]   ;;  %v1322_v51 = vld [vmem:[#allocation12 + $0x18] sm:$0xff]  }
  0x5c   :  { %1195 = vmatpush3.bf16.msra.mxu1 %v1290_v14  ;;  %1116 = vmatprep.subr.bf16.mxu0 %v1291_v15  ;;  %v1319_v49 = vld [vmem:[#allocation12 + $0x20] sm:$0xff]   ;;  %v1324_v52 = vld [vmem:[#allocation12 + $0x50] sm:$0xff]   ;;  %v1327_v54 = vld [vmem:[#allocation12 + $0x48] sm:$0xff]  }
  0x5d   :  { %1196 = vmatprep.subr.bf16.mxu1 %v1489_v1  ;;  %v1325_v53 = vld [vmem:[#allocation12 + $0x10] sm:$0xff]   ;;  %v1328_v55 = vld [vmem:[#allocation12 + $0x8] sm:$0xff]   ;;  %v1330_v56 = vld [vmem:[#allocation12 + $0x40] sm:$0xff]  }
  0x5e   :  { %v1331_v57 = vld [vmem:[#allocation12] sm:$0xff]   ;;  %v553_v58 = vld [vmem:[#allocation7] sm:$0xff]  ;;  %v554_v59 = vld [vmem:[#allocation7 + $0x8] sm:$0xff] }
  0x5f   :  { %1117 = vmatpush3.bf16.msra.mxu0 %v1292_v16  ;;  %v1303_v35 = vld [vmem:[#allocation2 + $0x8] ss:$0 sps:$4 sm:$0xff]   ;;  %v1351_v60 = vpack.c.bf16 %v553_v58, %v553_v58  ;;  %v1352_v61 = vpack.c.bf16 %v554_v59, %v554_v59  ;;  %v1024_v3 = vld [vmem:[%s1661_s3] ss:$0 sm:$0xff]  ;;  %v1339_v26 = vld [vmem:[#allocation13 + $0x28] sm:$0xff]  }
  0x60   :  { %1197 = vmatpush3.bf16.msra.mxu1 %v1293_v17  ;;  %1118 = vmatprep.subr.bf16.mxu0 %v1294_v18  ;;  %v555_v62 = vld [vmem:[#allocation7 + $0x10] sm:$0xff]  ;;  %v1323_v16 = vld [vmem:[#allocation12 + $0xb0] sm:$0xff]   ;;  %v1326_v17 = vld [vmem:[#allocation12 + $0xa8] sm:$0xff]  }
  0x61   :  { %1198 = vmatprep.subr.bf16.mxu1 %v1489_v1  ;;  %v1107_v63 = vpack.c.bf16 %v555_v62, %v555_v62  ;;  %v1320_v14 = vld [vmem:[#allocation12 + $0xb8] sm:$0xff]   ;;  %v1329_v18 = vld [vmem:[#allocation12 + $0xa0] sm:$0xff]   ;;  %v1338_v25 = vld [vmem:[#allocation13 + $0x30] sm:$0xff]  }
  0x62   :  { %v1340_v27 = vld [vmem:[#allocation13 + $0x20] sm:$0xff]   ;;  %v1341_v28 = vld [vmem:[#allocation13 + $0x18] sm:$0xff]   ;;  %v1101_v58 = vld [vmem:[%s1669_s11] ss:$0 sm:$0xff] }
  0x63   :  { %1119 = vmatpush3.bf16.msra.mxu0 %v1295_v19  ;;  %570 = vst.msk [vmem:[#allocation3 + $0x8] sm:$0xf] %vm144_vm2, %v1107_v63  ;;  %v1332_v19 = vld [vmem:[#allocation12 + $0x98] sm:$0xff]  }
  0x64   :  { %1199 = vmatpush3.bf16.msra.mxu1 %v1296_v20  ;;  %1120 = vmatprep.subr.bf16.mxu0 %v1297_v21  ;;  %v1333_v20 = vld [vmem:[#allocation12 + $0x90] sm:$0xff]   ;;  %v1334_v21 = vld [vmem:[#allocation12 + $0x88] sm:$0xff]  }
  0x65   :  { %1200 = vmatprep.subr.bf16.mxu1 %v1489_v1 }
  0x67   :  { %1121 = vmatpush3.bf16.msra.mxu0 %v1298_v22  ;;  %v1335_v22 = vld [vmem:[#allocation12 + $0x80] sm:$0xff]  }
  0x68   :  { %1201 = vmatpush3.bf16.msra.mxu1 %v1299_v23  ;;  %1122 = vmatprep.subr.bf16.mxu0 %v1300_v24  ;;  %v1337_v24 = vld [vmem:[#allocation13 + $0x38] sm:$0xff]  }
  0x69   :  { %1202 = vmatprep.subr.bf16.mxu1 %v1489_v1 }
  0x6a   :  { %v1336_v23 = vld [vmem:[#allocation3 + $0x8] ss:$0 sps:$4 sm:$0xff]  }
  0x6b   :  { %1123 = vmatpush3.bf16.msra.mxu0 %v1301_v29 }
  0x6c   :  { %1203 = vmatpush3.bf16.msra.mxu1 %v1302_v31  ;;  %1208 = vmatprep.subr.bf16.mxu0 %v1489_v1 }
  0x6d   :  { %1148 = vmatprep.subr.bf16.mxu1 %v1309_v39 }
  0x6e   :  { %391 = vmatmul.mubr.bf16.vlgmr.msra.gmra.mxu0 %v1350_v33 }
  0x6f   :  { %1209 = vmatpush3.bf16.msra.mxu0 %v1304_v32  ;;  %1224 = vmatprep.mubr.msk.bf16.mxu0 %vm1490_vm1, %v1489_v1  ;;  %v1342_v32 = vld [vmem:[#allocation13 + $0x10] sm:$0xff]  }
  0x70   :  { %1205 = vmatmul.mubr.bf16.vlgmr.msra.gmra.mxu1 %v1303_v35  ;;  %1210 = vmatprep.subr.bf16.mxu0 %v1489_v1  ;;  %v1343_v35 = vld [vmem:[#allocation13 + $0x8] sm:$0xff]  }
  0x71   :  { %1149 = vmatpush3.bf16.msra.mxu1 %v1311_v41  ;;  %815 = vmatprep.mubr.bf16.mxu1 %v1352_v61  ;;  %v1100_v41 = vld [vmem:[%s1668_s10] ss:$0 sm:$0xff] }
  0x72   :  { %1150 = vmatprep.subr.bf16.mxu1 %v1312_v42 }
  0x73   :  { %1211 = vmatpush3.bf16.msra.mxu0 %v1305_v34 }
  0x74   :  { %1212 = vmatprep.subr.bf16.mxu0 %v1489_v1 }
  0x75   :  { %1151 = vmatpush3.bf16.msra.mxu1 %v1314_v44 }
  0x76   :  { %1152 = vmatprep.subr.bf16.mxu1 %v1315_v45 }
  0x77   :  { %1213 = vmatpush3.bf16.msra.mxu0 %v1306_v36  ;;  %v1344_v36 = vld [vmem:[#allocation13] sm:$0xff]  }
  0x78   :  { %1214 = vmatprep.subr.bf16.mxu0 %v1489_v1 }
  0x79   :  { %1153 = vmatpush3.bf16.msra.mxu1 %v1317_v47 }
  0x7a   :  { %1154 = vmatprep.subr.bf16.mxu1 %v1318_v48 }
  0x7b   :  { %1215 = vmatpush3.bf16.msra.mxu0 %v1307_v37  ;;  %v1052_v37 = vld [vmem:[%s1663_s5] ss:$0 sm:$0xff] }
  0x7c   :  { %1216 = vmatprep.subr.bf16.mxu0 %v1489_v1 }
  0x7d   :  { %1155 = vmatpush3.bf16.msra.mxu1 %v1319_v49 }
  0x7e   :  { %1156 = vmatprep.subr.bf16.mxu1 %v1321_v50 }
  0x7f   :  { %1217 = vmatpush3.bf16.msra.mxu0 %v1308_v38 }
  0x80   :  { %1218 = vmatprep.subr.bf16.mxu0 %v1489_v1 }
  0x81   :  { %1157 = vmatpush3.bf16.msra.mxu1 %v1322_v51 }
  0x82   :  { %1158 = vmatprep.subr.bf16.mxu1 %v1324_v52 }
  0x83   :  { %1219 = vmatpush3.bf16.msra.mxu0 %v1310_v40 }
  0x84   :  { %1220 = vmatprep.subr.bf16.mxu0 %v1489_v1 }
  0x85   :  { %1159 = vmatpush3.bf16.msra.mxu1 %v1325_v53 }
  0x86   :  { %1160 = vmatprep.subr.bf16.mxu1 %v1327_v54  ;;  %v1091_v54 = vld [vmem:[%s1667_s9] ss:$0 sm:$0xff] }
  0x87   :  { %1221 = vmatpush3.bf16.msra.mxu0 %v1313_v43 }
  0x88   :  { %1222 = vmatprep.subr.bf16.mxu0 %v1489_v1 }
  0x89   :  { %1161 = vmatpush3.bf16.msra.mxu1 %v1328_v55 }
  0x8a   :  { %1162 = vmatprep.subr.bf16.mxu1 %v1330_v56 }
  0x8b   :  { %1223 = vmatpush3.bf16.msra.mxu0 %v1316_v46 }
  0x8c   :  { %1228 = vmatprep.subr.bf16.mxu0 %v1489_v1 }
  0x8d   :  { %1163 = vmatpush3.bf16.msra.mxu1 %v1331_v57 }
  0x8e   :  { %1248 = vmatprep.subr.bf16.mxu1 %v1489_v1 }
  0x90   :  { %816 = vmatmul.mubr.bf16.vlgmr.msra.gmra.mxu1 %v1351_v60 }
  0x91   :  { %1264 = vmatprep.mubr.msk.bf16.mxu1 %vm1490_vm1, %v1489_v1  ;;  %1249 = vmatpush3.bf16.msra.mxu1 %v1337_v24 }
  0x92   :  { %1250 = vmatprep.subr.bf16.mxu1 %v1489_v1 }
  0x95   :  { %1251 = vmatpush3.bf16.msra.mxu1 %v1338_v25 }
  0x96   :  { %1252 = vmatprep.subr.bf16.mxu1 %v1489_v1 }
  0x99   :  { %1253 = vmatpush3.bf16.msra.mxu1 %v1339_v26 }
  0x9a   :  { %1254 = vmatprep.subr.bf16.mxu1 %v1489_v1 }
  0x9d   :  { %1255 = vmatpush3.bf16.msra.mxu1 %v1340_v27 }
  0x9e   :  { %1256 = vmatprep.subr.bf16.mxu1 %v1489_v1 }
  0xa1   :  { %1257 = vmatpush3.bf16.msra.mxu1 %v1341_v28 }
  0xa2   :  { %1258 = vmatprep.subr.bf16.mxu1 %v1489_v1 }
  0xa5   :  { %1259 = vmatpush3.bf16.msra.mxu1 %v1342_v32 }
  0xa6   :  { %1260 = vmatprep.subr.bf16.mxu1 %v1489_v1 }
  0xa9   :  { %1261 = vmatpush3.bf16.msra.mxu1 %v1343_v35 }
  0xaa   :  { %1262 = vmatprep.subr.bf16.mxu1 %v1489_v1 }
  0xad   :  { %1263 = vmatpush3.bf16.msra.mxu1 %v1344_v36 }
 0x12e   :  { %v1124_v0 = vpop.f32.mrf.mxu0 }
 0x130   :  { %v432_v2 = vpop.f32.mrf.mxu1  ;;  %v1125_v4 = vpop.f32.mrf.mxu0 }
 0x131   :  { %v1126_v5 = vadd.f32 %v1125_v4, %v1124_v0  ;;  %v1102_v0 = vld [vmem:[#allocation4] ss:$0 sm:$0xff] }
 0x132   :  { %v1206_v6 = vpop.f32.mrf.mxu1  ;;  %v1127_v7 = vpop.f32.mrf.mxu0 }
 0x133   :  { %v393_v8 = vadd.f32 %v1126_v5, %v1024_v3 }
 0x134   :  { %v435_v9 = vpop.f32.mrf.mxu1  ;;  %v1128_v10 = vpop.f32.mrf.mxu0 }
 0x135   :  { %v433_v11 = vadd.f32 %v432_v2, %v393_v8 }
 0x136   :  { %v1207_v12 = vpop.f32.mrf.mxu1 }
 0x137   :  { %v438_v13 = vmax.f32 %v433_v11, 0.0 }
 0x139   :  { %v439_v15 = vpack.c.bf16 %v438_v13, %v438_v13 }
 0x13b   :  { %1225 = vmatmul.mubr.bf16.vlgmr.msra.gmra.mxu0 %v439_v15 }
 0x13c   :  { %1229 = vmatpush3.bf16.msra.mxu0 %v1320_v14  ;;  %1244 = vmatprep.mubr.msk.bf16.mxu0 %vm1490_vm1, %v1489_v1 }
 0x13d   :  { %1230 = vmatprep.subr.bf16.mxu0 %v1489_v1 }
 0x140   :  { %1231 = vmatpush3.bf16.msra.mxu0 %v1323_v16 }
 0x141   :  { %1232 = vmatprep.subr.bf16.mxu0 %v1489_v1 }
 0x144   :  { %1233 = vmatpush3.bf16.msra.mxu0 %v1326_v17 }
 0x145   :  { %1234 = vmatprep.subr.bf16.mxu0 %v1489_v1 }
 0x148   :  { %1235 = vmatpush3.bf16.msra.mxu0 %v1329_v18 }
 0x149   :  { %1236 = vmatprep.subr.bf16.mxu0 %v1489_v1 }
 0x14c   :  { %1237 = vmatpush3.bf16.msra.mxu0 %v1332_v19 }
 0x14d   :  { %1238 = vmatprep.subr.bf16.mxu0 %v1489_v1 }
 0x150   :  { %1239 = vmatpush3.bf16.msra.mxu0 %v1333_v20  ;;  %v1164_v29 = vpop.f32.mrf.mxu1 }
 0x151   :  { %1240 = vmatprep.subr.bf16.mxu0 %v1489_v1 }
 0x152   :  { %v1165_v30 = vpop.f32.mrf.mxu1 }
 0x153   :  { %v1166_v31 = vadd.f32 %v1165_v30, %v1164_v29 }
 0x154   :  { %1241 = vmatpush3.bf16.msra.mxu0 %v1334_v21  ;;  %v1167_v33 = vpop.f32.mrf.mxu1 }
 0x155   :  { %1242 = vmatprep.subr.bf16.mxu0 %v1489_v1  ;;  %v1063_v1 = vld [vmem:[%s1665_s7] ss:$0 sm:$0xff] }
 0x156   :  { %v1168_v34 = vpop.f32.mrf.mxu1  ;;  %v818_v46 = vadd.f32 %v1166_v31, %v1063_v1 }
 0x158   :  { %1243 = vmatpush3.bf16.msra.mxu0 %v1335_v22 }
 0x15b   :  { %1245 = vmatmul.mubr.bf16.vlgmr.msra.gmra.mxu0 %v1336_v23 }
 0x1fb   :  { %v545_v38 = vpop.f32.mrf.mxu0 }
 0x1fc   :  { %v546_v39 = vadd.f32 %v1052_v37, %v545_v38 }
 0x1fd   :  { %v1226_v40 = vpop.f32.mrf.mxu0 }
 0x1fe   :  { %v551_v42 = vmax.f32 %v546_v39, 0.0 }
 0x1ff   :  { %v548_v43 = vpop.f32.mrf.mxu0 }
 0x200   :  { %v984_v44 = vmul.f32 %v1100_v41, %v551_v42 }
 0x201   :  { %v1227_v45 = vpop.f32.mrf.mxu0 }
 0x202   :  { %985 = vadd.xlane.f32.xlu0 %v984_v44 }
 0x21b   :  { %v857_v47 = vpop.f32.mrf.mxu0 }
 0x21c   :  { %v858_v48 = vadd.f32 %v857_v47, %v818_v46 }
 0x21d   :  { %v1246_v49 = vpop.f32.mrf.mxu0 }
 0x21e   :  { %v863_v50 = vmax.f32 %v858_v48, 0.0 }
 0x21f   :  { %v860_v51 = vpop.f32.mrf.mxu0 }
 0x220   :  { %v864_v52 = vpack.c.bf16 %v863_v50, %v863_v50 }
 0x221   :  { %v1247_v53 = vpop.f32.mrf.mxu0 }
 0x222   :  { %1265 = vmatmul.mubr.bf16.vlgmr.msra.gmra.mxu1 %v864_v52 }
 0x28b   :  { %v986_v63 = vpop.xlane.xlu0 %985 }
 0x2e2   :  { %v970_v55 = vpop.f32.mrf.mxu1 }
 0x2e3   :  { %v971_v56 = vadd.f32 %v1091_v54, %v970_v55 }
 0x2e4   :  { %v1266_v57 = vpop.f32.mrf.mxu1 }
 0x2e5   :  { %v976_v59 = vmax.f32 %v971_v56, 0.0 }
 0x2e6   :  { %v973_v60 = vpop.f32.mrf.mxu1 }
 0x2e7   :  { %v994_v61 = vmul.f32 %v1101_v58, %v976_v59 }
 0x2e8   :  { %v1267_v62 = vpop.f32.mrf.mxu1 }
 0x2e9   :  { %995 = vadd.xlane.f32.xlu0 %v994_v61 }
 0x372   :  { %v996_v2 = vpop.xlane.xlu0 %995 }
 0x373   :  { %v997_v3 = vadd.f32 %v996_v2, %v986_v63 }
 0x375   :  { %v1005_v4 = vadd.f32 %v1102_v0, %v997_v3 }
 0x377   :  { %v1103_v5 = vmul.f32 -1.442695, %v1005_v4 }
 0x379   :  { %1345 = vpow2.f32 %v1103_v5 }
 0x386   :  { %v1346_v6 = vpop.eup %1345 }
 0x387   :  { %v1009_v7 = vadd.f32 1.0, %v1346_v6 }
 0x389   :  { %1347 = vrcp.f32 %v1009_v7 }
 0x396   :  { %v1348_v8 = vpop.eup %1347 }
 0x397   :  { %1013 = vst.msk [vmem:[%s1671_s13] sm:$0xff] %vm1012_vm3, %v1348_v8 }
 0x398   :  { %1018 = vsyncpa [#allocation6], 1 }
 0x399   :  { %1019 = vsyncpa [#allocation8], 1 }
 0x39a   :  { %1020 = vsyncpa [#allocation11], 1 }
 0x39b   :  { %1021 = vsyncpa [#allocation14], 1 }

</bundles_post_ra>
